<compile_context>
chip_gen: v7x
topology: tpu7x:2x2x1
jax: 0.10.0
libtpu: 0.0.40
codegen_flags: <defaults>
</compile_context>

<pallas_src>
import jax
import jax.numpy as jnp
from jax.experimental import pallas as pl
from jax.experimental.pallas import tpu as pltpu


def _round_up(x: int, m: int) -> int:
    return ((x + m - 1) // m) * m


def _fuzzy_variable_kernel(x_ref, mu_ref, coef_ref, mask_ref, o_ref):
    """Gaussian membership degrees for one batch tile.

    x_ref:    (TB, 1)  crisp inputs for this batch tile
    mu_ref:   (1, T)   Gaussian centers              (resident across the grid)
    coef_ref: (1, T)   -0.5 / sigma^2 per column     (0.0 in pad columns)
    mask_ref: (1, T)   1.0 for real MF columns, 0.0 for padding columns
    o_ref:    (TB, T)  membership degrees; padded columns are exactly 0
    """
    x = x_ref[...]                      # (TB, 1)
    mu = mu_ref[...]                    # (1, T)
    coef = coef_ref[...]                # (1, T)
    mask = mask_ref[...]                # (1, T)
    d = x - mu                          # broadcast -> (TB, T)
    # exp on the EUP; the mask multiply zeroes pad columns exactly (NaN-safe
    # for any finite x since pad coef is 0 -> exp(0) = 1 before masking).
    o_ref[...] = (jnp.exp(d * d * coef) * mask).astype(o_ref.dtype)


def _choose_batch_tiling(B: int, max_tile: int = 2048):
    """Pick (tb, b_pad): tb % 8 == 0, tb <= max_tile, small batch padding
    (<= 8 rows per grid step), and >= 2 grid steps whenever B > 8 so the v7x
    megacore can split the parallel batch axis across both TensorCores."""
    B8 = _round_up(max(B, 1), 8)
    if B8 <= 8:
        return B8, B8                        # single tiny step
    n_steps = max(2, pl.cdiv(B8, max_tile))
    tb = _round_up(pl.cdiv(B8, n_steps), 8)
    return tb, n_steps * tb                  # padding <= 8 * n_steps rows (<1% at scale)


def fuzzy_variable_forward(x, mu, sigma, pad_to=None, max_tile=2048,
                           out_dtype=jnp.float32):
    """JAX wrapper mirroring FuzzyVariable.forward (Gaussian MFs + zero pad).

    x:         (B, 1) crisp inputs.
    mu:        (M,)   Gaussian centers, one per membership function.
    sigma:     (M,)   Gaussian widths.
    pad_to:    if given and > M, output is zero-padded to (B, pad_to),
               matching FuzzyVariable.pad_to(size).
    max_tile:  max batch rows per pipelined grid step (multiple of 8).
    out_dtype: float32 by default; pass jnp.bfloat16 to halve store bytes on
               this store-bound kernel if the consumer accepts it.
    Returns (B, max(pad_to, M)) membership degrees.
    """
    x = x.astype(jnp.float32)
    B = x.shape[0]
    n_mfs = mu.shape[0]
    total = n_mfs if pad_to is None else max(pad_to, n_mfs)

    tb, b_pad = _choose_batch_tiling(B, max_tile)
    x_p = x if b_pad == B else jnp.pad(x, ((0, b_pad - B), (0, 0)))

    # Hoisted parameter rows (the divide never enters the kernel).  Pad-column
    # coef = 0 and mask = 0 reproduce the torch.cat-with-zeros padding exactly.
    mu32 = mu.astype(jnp.float32)
    sig32 = sigma.astype(jnp.float32)
    coef = -0.5 / (sig32 * sig32)
    mu_p = jnp.zeros((1, total), jnp.float32).at[0, :n_mfs].set(mu32)
    coef_p = jnp.zeros((1, total), jnp.float32).at[0, :n_mfs].set(coef)
    mask_p = jnp.zeros((1, total), jnp.float32).at[0, :n_mfs].set(1.0)

    grid = (b_pad // tb,)

    out = pl.pallas_call(
        _fuzzy_variable_kernel,
        out_shape=jax.ShapeDtypeStruct((b_pad, total), out_dtype),
        grid=grid,
        in_specs=[
            pl.BlockSpec((tb, 1), lambda i: (i, 0)),        # x batch tile
            pl.BlockSpec((1, total), lambda i: (0, 0)),     # mu    (resident)
            pl.BlockSpec((1, total), lambda i: (0, 0)),     # coef  (resident)
            pl.BlockSpec((1, total), lambda i: (0, 0)),     # mask  (resident)
        ],
        out_specs=pl.BlockSpec((tb, total), lambda i: (i, 0)),
        compiler_params=pltpu.CompilerParams(
            dimension_semantics=("parallel",)),
    )(x_p, mu_p, coef_p, mask_p)

    # No column slice ever; batch slice only when padding rows were added.
    return out if b_pad == B else out[:B]


def _reference_forward(x, mu, sigma, pad_to=None):
    """Pure-JAX re-implementation of the PyTorch forward for checking."""
    outs = [jnp.exp(-((x - mu[i]) ** 2) / (2.0 * sigma[i] ** 2))
            for i in range(mu.shape[0])]
    result = jnp.concatenate(outs, axis=1)  # (B, M)
    if pad_to is not None and pad_to > mu.shape[0]:
        zeros = jnp.zeros((x.shape[0], pad_to - mu.shape[0]), result.dtype)
        result = jnp.concatenate([result, zeros], axis=1)
    return result


if __name__ == "__main__":
    key = jax.random.PRNGKey(0)
    kx, ksig, kx2, kx3 = jax.random.split(key, 4)

    batch = 8
    n_mfs = 5       # FuzzyVariable built from 5 Gaussian membership functions
    pad_to = 8      # FuzzyVariable.pad_to(8) -> padding = 3

    x = jax.random.normal(kx, (batch, 1), dtype=jnp.float32)
    mu = jnp.linspace(-2.0, 2.0, n_mfs).astype(jnp.float32)
    sigma = 0.5 + 0.5 * jax.random.uniform(ksig, (n_mfs,), dtype=jnp.float32)

    out = jax.block_until_ready(
        fuzzy_variable_forward(x, mu, sigma, pad_to=pad_to))
    ref = _reference_forward(x, mu, sigma, pad_to=pad_to)
    assert out.shape == (batch, pad_to), out.shape
    assert jnp.allclose(out, ref, atol=1e-5, rtol=1e-5), "mismatch vs reference"

    # Multi-step pipelined grid (B > 8 -> >= 2 grid steps) + batch-pad slice.
    x_big = jax.random.normal(kx2, (24, 1), dtype=jnp.float32)
    out_big = jax.block_until_ready(
        fuzzy_variable_forward(x_big, mu, sigma, pad_to=pad_to))
    ref_big = _reference_forward(x_big, mu, sigma, pad_to=pad_to)
    assert out_big.shape == (24, pad_to), out_big.shape
    assert jnp.allclose(out_big, ref_big, atol=1e-5, rtol=1e-5), "grid mismatch"

    # No pad_to: odd column count exercises the full-dim (non-128) last axis.
    x_odd = jax.random.normal(kx3, (16, 1), dtype=jnp.float32)
    out_odd = jax.block_until_ready(fuzzy_variable_forward(x_odd, mu, sigma))
    ref_odd = _reference_forward(x_odd, mu, sigma)
    assert out_odd.shape == (16, n_mfs), out_odd.shape
    assert jnp.allclose(out_odd, ref_odd, atol=1e-5, rtol=1e-5), "no-pad mismatch"

    print("KERNEL_OK")
</pallas_src>

<mosaic_0001>
module attributes {stable_mosaic.version = 11 : i64} {
  func.func @_fuzzy_variable_kernel(%arg0: i32, %arg1: memref<8x1xf32, #tpu.memory_space<vmem>>, %arg2: memref<1x8xf32, #tpu.memory_space<vmem>>, %arg3: memref<1x8xf32, #tpu.memory_space<vmem>>, %arg4: memref<1x8xf32, #tpu.memory_space<vmem>>, %arg5: memref<8x8xf32, #tpu.memory_space<vmem>>) attributes {dimension_semantics = [#tpu.dimension_semantics<parallel>], iteration_bounds = array<i64: 1>, scalar_prefetch = 0 : i64, scratch_operands = 0 : i64, tpu.core_type = #tpu.core_type<tc>, window_params = [{transform_indices = @transform_0, window_bounds = array<i64: 8, 1>}, {pipeline_mode = #tpu.pipeline_mode<synchronous>, transform_indices = @transform_1, window_bounds = array<i64: 1, 8>}, {pipeline_mode = #tpu.pipeline_mode<synchronous>, transform_indices = @transform_2, window_bounds = array<i64: 1, 8>}, {pipeline_mode = #tpu.pipeline_mode<synchronous>, transform_indices = @transform_3, window_bounds = array<i64: 1, 8>}, {transform_indices = @transform_4, window_bounds = array<i64: 8, 8>}]} {
    %c0 = arith.constant 0 : index
    %c0_0 = arith.constant 0 : index
    %0 = vector.load %arg1[%c0, %c0_0] : memref<8x1xf32, #tpu.memory_space<vmem>>, vector<8x1xf32>
    %c0_1 = arith.constant 0 : index
    %c0_2 = arith.constant 0 : index
    %1 = vector.load %arg2[%c0_1, %c0_2] : memref<1x8xf32, #tpu.memory_space<vmem>>, vector<1x8xf32>
    %c0_3 = arith.constant 0 : index
    %c0_4 = arith.constant 0 : index
    %2 = vector.load %arg3[%c0_3, %c0_4] : memref<1x8xf32, #tpu.memory_space<vmem>>, vector<1x8xf32>
    %c0_5 = arith.constant 0 : index
    %c0_6 = arith.constant 0 : index
    %3 = vector.load %arg4[%c0_5, %c0_6] : memref<1x8xf32, #tpu.memory_space<vmem>>, vector<1x8xf32>
    %4 = vector.broadcast %0 : vector<8x1xf32> to vector<8x8xf32>
    %5 = vector.broadcast %1 : vector<1x8xf32> to vector<8x8xf32>
    %6 = arith.subf %4, %5 : vector<8x8xf32>
    %7 = arith.mulf %6, %6 : vector<8x8xf32>
    %8 = vector.broadcast %2 : vector<1x8xf32> to vector<8x8xf32>
    %9 = arith.mulf %7, %8 : vector<8x8xf32>
    %10 = math.exp %9 : vector<8x8xf32>
    %11 = vector.broadcast %3 : vector<1x8xf32> to vector<8x8xf32>
    %12 = arith.mulf %10, %11 : vector<8x8xf32>
    %c0_7 = arith.constant 0 : index
    %c0_8 = arith.constant 0 : index
    %13 = vector.load %arg5[%c0_7, %c0_8] : memref<8x8xf32, #tpu.memory_space<vmem>>, vector<8x8xf32>
    tpu.vector_store %arg5[%c0_7, %c0_8], %12 {strides = array<i32>} : memref<8x8xf32, #tpu.memory_space<vmem>>, vector<8x8xf32>,
    return
  }
  func.func @transform_0(%arg0: i32) -> (i32, i32) {
    %c0_i32 = arith.constant 0 : i32
    %c0_i32_0 = arith.constant 0 : i32
    return %arg0, %c0_i32 : i32, i32
  }
  func.func @transform_1(%arg0: i32) -> (i32, i32) {
    %c0_i32 = arith.constant 0 : i32
    %c0_i32_0 = arith.constant 0 : i32
    %c0_i32_1 = arith.constant 0 : i32
    return %c0_i32, %c0_i32_0 : i32, i32
  }
  func.func @transform_2(%arg0: i32) -> (i32, i32) {
    %c0_i32 = arith.constant 0 : i32
    %c0_i32_0 = arith.constant 0 : i32
    %c0_i32_1 = arith.constant 0 : i32
    return %c0_i32, %c0_i32_0 : i32, i32
  }
  func.func @transform_3(%arg0: i32) -> (i32, i32) {
    %c0_i32 = arith.constant 0 : i32
    %c0_i32_0 = arith.constant 0 : i32
    %c0_i32_1 = arith.constant 0 : i32
    return %c0_i32, %c0_i32_0 : i32, i32
  }
  func.func @transform_4(%arg0: i32) -> (i32, i32) {
    %c0_i32 = arith.constant 0 : i32
    %c0_i32_0 = arith.constant 0 : i32
    return %arg0, %c0_i32 : i32, i32
  }
}

</mosaic_0001>

<bundles_post_ra>
// kernel: tpu_custom_call.1
= control target key start
LH: loop header
LB: loop body
LE: loop exit
PB: predicated region body
PF: predicated region fallthrough
CT: control target
= control target key end

     0   :  { %v99_v1 = vmov 0   ;;  %s150_s0 = inlined_call_operand.vmem [shape: f32[8,1], index: 0, kind: input, shape index: {}]   ;;  %s151_s1 = inlined_call_operand.vmem [shape: f32[1,8], index: 1, kind: input, shape index: {}]   ;;  %s152_s2 = inlined_call_operand.vmem [shape: f32[1,8], index: 2, kind: input, shape index: {}]   ;;  %s153_s3 = inlined_call_operand.vmem [shape: f32[1,8], index: 3, kind: input, shape index: {}]   ;;  %s154_s4 = inlined_call_operand.hbm [shape: f32[8,8], index: 4, kind: output, shape index: {}]  }
   0x1   :  { %v18_v0 = vld [vmem:[%s150_s0] sm:$0xff]  ;;  %72 = vset.pattern.permute.xlu0 %v99_v1 }
   0x2   :  { %9 = vsyncpa [#allocation3], 0  ;;  %24 = vperm.xlu0 %72, %v18_v0   ;;  %v67_v2 = vld [vmem:[%s151_s1] ss:$0 sm:$0xff]  ;;  %s100_s22 = smov [#allocation2]   ;;  %vm51_vm0 = vcmask 64512  }
   0x3   :  { %v68_v5 = vld [vmem:[%s152_s2] ss:$0 sm:$0xff]  ;;  %s59_s23 = sshll.u32 %s100_s22, 4  ;;  %s60_s23 = int_to_ptr.vmem [resolvable:$true] %s59_s23 }
   0x4   :  { %v69_v9 = vld [vmem:[%s153_s3] ss:$0 sm:$0xff]  ;;  %s75_s1 = scalar_lea.vmem %s60_s23, 128  ;;  %p80_p1 = scmp.lt.s32.totalorder %s60_s23, %s60_s23 }
   0x5   :  { %p76_p0 = scmp.ne.s32.totalorder %s60_s23, %s75_s1  ;;  %p81_p2 = scmp.lt.s32.totalorder %s75_s1, %s75_s1 }
   0x7   :  { %p82_p3 = por %p81_p2, %p80_p1 }
   0x9   :  { %p83_p4 = pnand %p82_p3, %p76_p0 }
  0x81   :  { %v25_v3 = vpop.permute.xlu0 %24 }
  0x82   :  { %v33_v4 = vsub.f32 %v25_v3, %v67_v2 }
  0x84   :  { %v34_v6 = vmul.f32 %v33_v4, %v33_v4 }
  0x86   :  { %v41_v7 = vmul.f32 %v68_v5, %v34_v6 }
  0x88   :  { %v42_v8 = vmul.f32 1.442695, %v41_v7 }
  0x8a   :  { %73 = vpow2.f32 %v42_v8 }
  0x94   :  { %v74_v10 = vpop.eup %73 }
  0x95   :  { %v50_v11 = vmul.f32 %v74_v10, %v69_v9 }
  0x97   :  { %52 = vst.msk [vmem:[#allocation2] sm:$0xff] %vm51_vm0, %v50_v11 }
  0x98   :  { %86 = shalt.err (!%p83_p4)
}
  0x99   :  { %s87_s25 = scalar_lea.hbm %s154_s4, 128 }
  0x9a   :  { %p88_p5 = scmp.ne.s32.totalorder %s154_s4, %s87_s25  ;;  %p91_p6 = scmp.lt.u32.totalorder %s87_s25, %s154_s4 }
  0x9c   :  { %p93_p7 = pnand %p91_p6, %p88_p5 }
  0x9e   :  { %96 = shalt.err (!%p93_p7)
}
  0x9f   :  { %62 = dma.vmem_to_hbm [thread:$0]  %s60_s23, 128, %s154_s4, [#allocation3]  }
  0xa0   :  { %97 = dma.done.wait [#allocation3], 128  }
  0xa1   :  { %98 = vsyncadd [#allocation3], 4294967168 }
  0xa2   :  { %66 = vsyncpa [#allocation3], 1 }

</bundles_post_ra>
